<compile_context>
chip_gen: v7x
topology: tpu7x:2x2x1
jax: 0.10.0
libtpu: 0.0.40
codegen_flags: <defaults>
</compile_context>

<pallas_src>
import functools

import jax
import jax.numpy as jnp
from jax import lax
from jax.experimental import pallas as pl
from jax.experimental.pallas import tpu as pltpu


def _pick_kv_block(n, override=None):
    """Choose the KV tile.  Single tile (full softmax) for moderate N, flash tiles for large N."""
    if override is not None and 0 < override <= n and n % override == 0:
        return override
    if n <= 512:
        return n
    for t in (512, 256, 128):
        if n % t == 0:
            return t
    # TODO(synk): masked ragged KV tiles; fall back to single-tile softmax.
    return n


def _mhsa_kernel(x_ref, wqkv_ref, wp_ref, b_ref, o_ref, qkv_ref, ctx_ref, *,
                 num_heads, kv_block):
    """One grid step = one batch element.

    x_ref:    (1, N, C)   VMEM  activations for batch b (streamed per batch)
    wqkv_ref: (C, 3C)     VMEM  combined [q|k|v] weight, scale folded into q (resident)
    wp_ref:   (C, C)      VMEM  output projection weight (resident)
    b_ref:    (1, C) f32  VMEM  output projection bias (resident)
    o_ref:    (1, N, C)   VMEM  output for batch b
    qkv_ref:  (N, 3C) f32 VMEM  scratch: fused QKV activations
    ctx_ref:  (N, C)  f32 VMEM  scratch: per-head contexts, head-major in lanes
    """
    x = x_ref[0]                                   # (N, C)
    n, c = x.shape
    dt = x.dtype                                   # MXU operand dtype (f32 or bf16)
    hd = c // num_heads
    n_kv = n // kv_block

    # (1) Fused QKV projection: one lane-dense (N, C) @ (C, 3C) MXU matmul.
    qkv_ref[...] = jnp.dot(x, wqkv_ref[...], preferred_element_type=jnp.float32)

    # (2) Static head loop: weights stay VMEM-resident, every slice offset is static
    #     (no dynamic lane indexing, no per-head weight DMA, no per-head grid step).
    for h in range(num_heads):
        q = qkv_ref[:, h * hd:(h + 1) * hd].astype(dt)                    # (N, hd)

        if n_kv == 1:
            # Single-tile numerically-stable softmax (small / moderate N).
            k = qkv_ref[:, c + h * hd:c + (h + 1) * hd].astype(dt)        # (N, hd)
            v = qkv_ref[:, 2 * c + h * hd:2 * c + (h + 1) * hd].astype(dt)
            s = lax.dot_general(q, k, (((1,), (1,)), ((), ())),
                                preferred_element_type=jnp.float32)       # (N, N) f32
            s = s - jnp.max(s, axis=-1, keepdims=True)
            p = jnp.exp(s)
            inv = pl.reciprocal(jnp.sum(p, axis=-1, keepdims=True), approx=True)
            ctx = jnp.dot(p.astype(dt), v, preferred_element_type=jnp.float32) * inv
        else:
            # (3) KV-tiled online softmax (flash): never materialize the (N, N) tile.
            def body(kt, carry):
                m, l, acc = carry
                koff = pl.multiple_of(kt * kv_block, kv_block)
                k = qkv_ref[pl.ds(koff, kv_block),
                            c + h * hd:c + (h + 1) * hd].astype(dt)        # (TK, hd)
                v = qkv_ref[pl.ds(koff, kv_block),
                            2 * c + h * hd:2 * c + (h + 1) * hd].astype(dt)
                s = lax.dot_general(q, k, (((1,), (1,)), ((), ())),
                                    preferred_element_type=jnp.float32)    # (N, TK)
                m_new = jnp.maximum(m, jnp.max(s, axis=-1, keepdims=True))
                alpha = jnp.exp(m - m_new)
                p = jnp.exp(s - m_new)
                l_new = alpha * l + jnp.sum(p, axis=-1, keepdims=True)
                acc_new = alpha * acc + jnp.dot(p.astype(dt), v,
                                                preferred_element_type=jnp.float32)
                return m_new, l_new, acc_new

            carry0 = (jnp.full((n, 1), -jnp.inf, dtype=jnp.float32),
                      jnp.zeros((n, 1), dtype=jnp.float32),
                      jnp.zeros((n, hd), dtype=jnp.float32))
            _, l, acc = lax.fori_loop(0, n_kv, body, carry0)
            ctx = acc * pl.reciprocal(l, approx=True)

        # attn_drop is identity (p = 0.0).  Store this head's context into its lane slot.
        ctx_ref[:, h * hd:(h + 1) * hd] = ctx

    # (4) Single full-depth (K = C) output projection + bias; proj_drop is identity.
    out = jnp.dot(ctx_ref[...].astype(dt), wp_ref[...],
                  preferred_element_type=jnp.float32) + b_ref[...]
    o_ref[0] = out.astype(o_ref.dtype)


def attention_pallas(x, wqkv_t, wproj_t, bproj, *, num_heads, qk_scale=None,
                     kv_block=None):
    """x: (B, N, C); wqkv_t: (C, 3C) pre-transposed; wproj_t: (C, C); bproj: (C,).

    Matmuls run in x.dtype (pass bf16 for v6e/v7x MXU peak); softmax, scratches and
    accumulation stay in f32.
    """
    B, N, C = x.shape
    assert C % num_heads == 0, "dim must be divisible by num_heads"
    hd = C // num_heads
    scale = qk_scale if qk_scale is not None else hd ** (-0.5)
    dt = x.dtype

    kv_blk = _pick_kv_block(N, kv_block)

    # Combined qkv weight in PyTorch column order [q | k | v], softmax scale folded into q.
    wqkv = jnp.concatenate([wqkv_t[:, :C] * scale, wqkv_t[:, C:]], axis=1).astype(dt)
    wp = wproj_t.astype(dt)
    b2 = bproj.astype(jnp.float32).reshape(1, C)

    # VMEM budget: double-buffered blocks + resident weights + f32 scratches + softmax
    # temporaries, clamped to 80% of physical VMEM (v7x: 64 MiB per TensorCore).
    isz = jnp.dtype(dt).itemsize
    need = (2 * N * C * isz                                   # x block (double-buffered)
            + 2 * N * C * isz                                 # out block
            + 2 * (3 * C * C + C * C) * isz + 2 * C * 4       # resident weights + bias
            + N * 3 * C * 4 + N * C * 4                       # f32 qkv / ctx scratches
            + 4 * N * max(kv_blk, 128) * 4)                   # score/prob temporaries
    try:
        cap = int(getattr(pltpu.get_tpu_info(), "vmem_capacity_bytes", 64 << 20))
    except Exception:
        cap = 64 << 20
    vmem_limit = int(min(max(int(need * 1.25) + (2 << 20), 16 << 20), int(0.8 * cap)))

    kernel = functools.partial(_mhsa_kernel, num_heads=num_heads, kv_block=kv_blk)

    return pl.pallas_call(
        kernel,
        out_shape=jax.ShapeDtypeStruct((B, N, C), x.dtype),
        grid_spec=pltpu.PrefetchScalarGridSpec(
            num_scalar_prefetch=0,
            grid=(B,),
            in_specs=[
                pl.BlockSpec((1, N, C), lambda b: (b, 0, 0)),   # x, streamed per batch
                pl.BlockSpec((C, 3 * C), lambda b: (0, 0)),     # Wqkv, VMEM-resident
                pl.BlockSpec((C, C), lambda b: (0, 0)),         # Wproj, VMEM-resident
                pl.BlockSpec((1, C), lambda b: (0, 0)),         # proj bias, VMEM-resident
            ],
            out_specs=pl.BlockSpec((1, N, C), lambda b: (b, 0, 0)),
            scratch_shapes=[
                pltpu.VMEM((N, 3 * C), jnp.float32),            # fused QKV activations
                pltpu.VMEM((N, C), jnp.float32),                # head-major contexts
            ],
        ),
        compiler_params=pltpu.CompilerParams(
            dimension_semantics=("parallel",),
            vmem_limit_bytes=vmem_limit,
        ),
    )(x, wqkv, wp, b2)


def attention_reference(x, wqkv_t, wproj_t, bproj, *, num_heads, qk_scale=None):
    """Pure-JAX reference mirroring the PyTorch forward (eval mode), f32."""
    B, N, C = x.shape
    hd = C // num_heads
    scale = qk_scale if qk_scale is not None else hd ** (-0.5)
    qkv = x @ wqkv_t                                            # (B, N, 3C)
    qkv = qkv.reshape(B, N, 3, num_heads, hd).transpose(2, 0, 3, 1, 4)
    q, k, v = qkv[0], qkv[1], qkv[2]                            # (B, H, N, hd)
    attn = jnp.einsum('bhnd,bhmd->bhnm', q, k) * scale
    attn = jax.nn.softmax(attn, axis=-1)
    out = jnp.einsum('bhnm,bhmd->bhnd', attn, v)                # (B, H, N, hd)
    out = out.transpose(0, 2, 1, 3).reshape(B, N, C)
    return out @ wproj_t + bproj


if __name__ == "__main__":
    # Small shapes consistent with the module: dim (C) = 32, num_heads = 8,
    # batch B = 2, sequence N = 8.  (Do NOT tune perf at these lane-sparse shapes;
    # validate performance with C >= 128, e.g. ViT-B C=768, hd=64, N~197-1568.)
    B, N, C = 2, 8, 32
    num_heads = 8

    key = jax.random.PRNGKey(0)
    kx, kq, kp, kb, kx2 = jax.random.split(key, 5)

    x = jax.random.normal(kx, (B, N, C), dtype=jnp.float32)

    # Deterministic synthetic parameters (nn.Linear shapes), stored pre-transposed.
    # qkv:  weight (3C, C) -> transposed (C, 3C); qkv_bias=False so no qkv bias.
    # proj: weight (C, C)  -> transposed (C, C); bias (C,).
    wqkv_t = 0.1 * jax.random.normal(kq, (C, 3 * C), dtype=jnp.float32)
    wproj_t = 0.1 * jax.random.normal(kp, (C, C), dtype=jnp.float32)
    bproj = 0.1 * jax.random.normal(kb, (C,), dtype=jnp.float32)

    ref = attention_reference(x, wqkv_t, wproj_t, bproj, num_heads=num_heads)

    # f32 operands, single-tile softmax path (tolerance covers the approx reciprocal).
    out = jax.block_until_ready(
        attention_pallas(x, wqkv_t, wproj_t, bproj, num_heads=num_heads))
    assert out.shape == (B, N, C)
    assert jnp.allclose(out, ref, atol=2e-3, rtol=2e-3), "f32 kernel mismatch vs reference"

    # bf16 MXU operands (v6e/v7x fast path); softmax / accumulation remain f32.
    out_bf16 = jax.block_until_ready(
        attention_pallas(x.astype(jnp.bfloat16), wqkv_t, wproj_t, bproj,
                         num_heads=num_heads))
    assert out_bf16.shape == (B, N, C) and out_bf16.dtype == jnp.bfloat16
    assert jnp.allclose(out_bf16.astype(jnp.float32), ref, atol=5e-2, rtol=5e-2), \
        "bf16 kernel mismatch vs reference"

    # KV-tiled online-softmax (flash) path, forced at a small shape via kv_block override.
    N2 = 32
    x2 = jax.random.normal(kx2, (B, N2, C), dtype=jnp.float32)
    ref2 = attention_reference(x2, wqkv_t, wproj_t, bproj, num_heads=num_heads)
    out2 = jax.block_until_ready(
        attention_pallas(x2, wqkv_t, wproj_t, bproj, num_heads=num_heads, kv_block=8))
    assert out2.shape == (B, N2, C)
    assert jnp.allclose(out2, ref2, atol=2e-3, rtol=2e-3), \
        "flash (online-softmax) kernel mismatch vs reference"

    print("KERNEL_OK")
</pallas_src>

<mosaic_0001>
module attributes {stable_mosaic.version = 11 : i64} {
  func.func @_mhsa_kernel(%arg0: i32, %arg1: memref<1x8x32xf32, #tpu.memory_space<vmem>>, %arg2: memref<32x96xf32, #tpu.memory_space<vmem>>, %arg3: memref<32x32xf32, #tpu.memory_space<vmem>>, %arg4: memref<1x32xf32, #tpu.memory_space<vmem>>, %arg5: memref<1x8x32xf32, #tpu.memory_space<vmem>>, %arg6: memref<8x96xf32, #tpu.memory_space<vmem>>, %arg7: memref<8x32xf32, #tpu.memory_space<vmem>>) attributes {dimension_semantics = [#tpu.dimension_semantics<parallel>], iteration_bounds = array<i64: 2>, scalar_prefetch = 0 : i64, scratch_operands = 2 : i64, tpu.core_type = #tpu.core_type<tc>, window_params = [{transform_indices = @transform_0, window_bounds = array<i64: 1, 8, 32>}, {pipeline_mode = #tpu.pipeline_mode<synchronous>, transform_indices = @transform_1, window_bounds = array<i64: 32, 96>}, {pipeline_mode = #tpu.pipeline_mode<synchronous>, transform_indices = @transform_2, window_bounds = array<i64: 32, 32>}, {pipeline_mode = #tpu.pipeline_mode<synchronous>, transform_indices = @transform_3, window_bounds = array<i64: 1, 32>}, {transform_indices = @transform_4, window_bounds = array<i64: 1, 8, 32>}]} {
    %c0 = arith.constant 0 : index
    %c0_0 = arith.constant 0 : index
    %c0_1 = arith.constant 0 : index
    %0 = vector.load %arg1[%c0, %c0_0, %c0_1] : memref<1x8x32xf32, #tpu.memory_space<vmem>>, vector<1x8x32xf32>
    %1 = vector.shape_cast %0 : vector<1x8x32xf32> to vector<8x32xf32>
    %c0_2 = arith.constant 0 : index
    %c0_3 = arith.constant 0 : index
    %2 = vector.load %arg2[%c0_2, %c0_3] : memref<32x96xf32, #tpu.memory_space<vmem>>, vector<32x96xf32>
    %cst = arith.constant dense<0.000000e+00> : vector<8x96xf32>
    %3 = tpu.matmul %1, %2, %cst {dimension_numbers = #tpu.dot_dimension_numbers<[1], [0], [0], [1], [0, 0, 1, 1], [], []>} : vector<8x32xf32>, vector<32x96xf32>, vector<8x96xf32> -> vector<8x96xf32>
    %c0_4 = arith.constant 0 : index
    %c0_5 = arith.constant 0 : index
    %4 = vector.load %arg6[%c0_4, %c0_5] : memref<8x96xf32, #tpu.memory_space<vmem>>, vector<8x96xf32>
    tpu.vector_store %arg6[%c0_4, %c0_5], %3 {strides = array<i32>} : memref<8x96xf32, #tpu.memory_space<vmem>>, vector<8x96xf32>,
    %c0_6 = arith.constant 0 : index
    %c0_7 = arith.constant 0 : index
    %5 = vector.load %arg6[%c0_6, %c0_7] : memref<8x96xf32, #tpu.memory_space<vmem>>, vector<8x4xf32>
    %c0_8 = arith.constant 0 : index
    %c32 = arith.constant 32 : index
    %6 = vector.load %arg6[%c0_8, %c32] : memref<8x96xf32, #tpu.memory_space<vmem>>, vector<8x4xf32>
    %c0_9 = arith.constant 0 : index
    %c64 = arith.constant 64 : index
    %7 = vector.load %arg6[%c0_9, %c64] : memref<8x96xf32, #tpu.memory_space<vmem>>, vector<8x4xf32>
    %cst_10 = arith.constant dense<0.000000e+00> : vector<8x8xf32>
    %8 = tpu.matmul %5, %6, %cst_10 {dimension_numbers = #tpu.dot_dimension_numbers<[1], [1], [0], [0], [0, 0, 1, 0], [], []>} : vector<8x4xf32>, vector<8x4xf32>, vector<8x8xf32> -> vector<8x8xf32>
    %cst_11 = arith.constant dense<0xFF800000> : vector<8xf32>
    %9 = vector.multi_reduction <maximumf>, %8, %cst_11 [1] : vector<8x8xf32> to vector<8xf32>
    %10 = vector.shape_cast %9 : vector<8xf32> to vector<8x1xf32>
    %11 = vector.broadcast %10 : vector<8x1xf32> to vector<8x8xf32>
    %12 = arith.subf %8, %11 : vector<8x8xf32>
    %13 = math.exp %12 : vector<8x8xf32>
    %cst_12 = arith.constant dense<0.000000e+00> : vector<8xf32>
    %14 = vector.multi_reduction <add>, %13, %cst_12 [1] : vector<8x8xf32> to vector<8xf32>
    %15 = vector.shape_cast %14 : vector<8xf32> to vector<8x1xf32>
    %16 = tpu.reciprocal %15 {approx = true} : vector<8x1xf32> -> vector<8x1xf32>
    %cst_13 = arith.constant dense<0.000000e+00> : vector<8x4xf32>
    %17 = tpu.matmul %13, %7, %cst_13 {dimension_numbers = #tpu.dot_dimension_numbers<[1], [0], [0], [1], [0, 0, 1, 1], [], []>} : vector<8x8xf32>, vector<8x4xf32>, vector<8x4xf32> -> vector<8x4xf32>
    %18 = vector.broadcast %16 : vector<8x1xf32> to vector<8x4xf32>
    %19 = arith.mulf %17, %18 : vector<8x4xf32>
    %c0_14 = arith.constant 0 : index
    %c0_15 = arith.constant 0 : index
    %20 = vector.load %arg7[%c0_14, %c0_15] : memref<8x32xf32, #tpu.memory_space<vmem>>, vector<8x4xf32>
    tpu.vector_store %arg7[%c0_14, %c0_15], %19 {strides = array<i32>} : memref<8x32xf32, #tpu.memory_space<vmem>>, vector<8x4xf32>,
    %c0_16 = arith.constant 0 : index
    %c4 = arith.constant 4 : index
    %21 = vector.load %arg6[%c0_16, %c4] : memref<8x96xf32, #tpu.memory_space<vmem>>, vector<8x4xf32>
    %c0_17 = arith.constant 0 : index
    %c36 = arith.constant 36 : index
    %22 = vector.load %arg6[%c0_17, %c36] : memref<8x96xf32, #tpu.memory_space<vmem>>, vector<8x4xf32>
    %c0_18 = arith.constant 0 : index
    %c68 = arith.constant 68 : index
    %23 = vector.load %arg6[%c0_18, %c68] : memref<8x96xf32, #tpu.memory_space<vmem>>, vector<8x4xf32>
    %cst_19 = arith.constant dense<0.000000e+00> : vector<8x8xf32>
    %24 = tpu.matmul %21, %22, %cst_19 {dimension_numbers = #tpu.dot_dimension_numbers<[1], [1], [0], [0], [0, 0, 1, 0], [], []>} : vector<8x4xf32>, vector<8x4xf32>, vector<8x8xf32> -> vector<8x8xf32>
    %cst_20 = arith.constant dense<0xFF800000> : vector<8xf32>
    %25 = vector.multi_reduction <maximumf>, %24, %cst_20 [1] : vector<8x8xf32> to vector<8xf32>
    %26 = vector.shape_cast %25 : vector<8xf32> to vector<8x1xf32>
    %27 = vector.broadcast %26 : vector<8x1xf32> to vector<8x8xf32>
    %28 = arith.subf %24, %27 : vector<8x8xf32>
    %29 = math.exp %28 : vector<8x8xf32>
    %cst_21 = arith.constant dense<0.000000e+00> : vector<8xf32>
    %30 = vector.multi_reduction <add>, %29, %cst_21 [1] : vector<8x8xf32> to vector<8xf32>
    %31 = vector.shape_cast %30 : vector<8xf32> to vector<8x1xf32>
    %32 = tpu.reciprocal %31 {approx = true} : vector<8x1xf32> -> vector<8x1xf32>
    %cst_22 = arith.constant dense<0.000000e+00> : vector<8x4xf32>
    %33 = tpu.matmul %29, %23, %cst_22 {dimension_numbers = #tpu.dot_dimension_numbers<[1], [0], [0], [1], [0, 0, 1, 1], [], []>} : vector<8x8xf32>, vector<8x4xf32>, vector<8x4xf32> -> vector<8x4xf32>
    %34 = vector.broadcast %32 : vector<8x1xf32> to vector<8x4xf32>
    %35 = arith.mulf %33, %34 : vector<8x4xf32>
    %c0_23 = arith.constant 0 : index
    %c4_24 = arith.constant 4 : index
    %36 = vector.load %arg7[%c0_23, %c4_24] : memref<8x32xf32, #tpu.memory_space<vmem>>, vector<8x4xf32>
    tpu.vector_store %arg7[%c0_23, %c4_24], %35 {strides = array<i32>} : memref<8x32xf32, #tpu.memory_space<vmem>>, vector<8x4xf32>,
    %c0_25 = arith.constant 0 : index
    %c8 = arith.constant 8 : index
    %37 = vector.load %arg6[%c0_25, %c8] : memref<8x96xf32, #tpu.memory_space<vmem>>, vector<8x4xf32>
    %c0_26 = arith.constant 0 : index
    %c40 = arith.constant 40 : index
    %38 = vector.load %arg6[%c0_26, %c40] : memref<8x96xf32, #tpu.memory_space<vmem>>, vector<8x4xf32>
    %c0_27 = arith.constant 0 : index
    %c72 = arith.constant 72 : index
    %39 = vector.load %arg6[%c0_27, %c72] : memref<8x96xf32, #tpu.memory_space<vmem>>, vector<8x4xf32>
    %cst_28 = arith.constant dense<0.000000e+00> : vector<8x8xf32>
    %40 = tpu.matmul %37, %38, %cst_28 {dimension_numbers = #tpu.dot_dimension_numbers<[1], [1], [0], [0], [0, 0, 1, 0], [], []>} : vector<8x4xf32>, vector<8x4xf32>, vector<8x8xf32> -> vector<8x8xf32>
    %cst_29 = arith.constant dense<0xFF800000> : vector<8xf32>
    %41 = vector.multi_reduction <maximumf>, %40, %cst_29 [1] : vector<8x8xf32> to vector<8xf32>
    %42 = vector.shape_cast %41 : vector<8xf32> to vector<8x1xf32>
    %43 = vector.broadcast %42 : vector<8x1xf32> to vector<8x8xf32>
    %44 = arith.subf %40, %43 : vector<8x8xf32>
    %45 = math.exp %44 : vector<8x8xf32>
    %cst_30 = arith.constant dense<0.000000e+00> : vector<8xf32>
    %46 = vector.multi_reduction <add>, %45, %cst_30 [1] : vector<8x8xf32> to vector<8xf32>
    %47 = vector.shape_cast %46 : vector<8xf32> to vector<8x1xf32>
    %48 = tpu.reciprocal %47 {approx = true} : vector<8x1xf32> -> vector<8x1xf32>
    %cst_31 = arith.constant dense<0.000000e+00> : vector<8x4xf32>
    %49 = tpu.matmul %45, %39, %cst_31 {dimension_numbers = #tpu.dot_dimension_numbers<[1], [0], [0], [1], [0, 0, 1, 1], [], []>} : vector<8x8xf32>, vector<8x4xf32>, vector<8x4xf32> -> vector<8x4xf32>
    %50 = vector.broadcast %48 : vector<8x1xf32> to vector<8x4xf32>
    %51 = arith.mulf %49, %50 : vector<8x4xf32>
    %c0_32 = arith.constant 0 : index
    %c8_33 = arith.constant 8 : index
    %52 = vector.load %arg7[%c0_32, %c8_33] : memref<8x32xf32, #tpu.memory_space<vmem>>, vector<8x4xf32>
    tpu.vector_store %arg7[%c0_32, %c8_33], %51 {strides = array<i32>} : memref<8x32xf32, #tpu.memory_space<vmem>>, vector<8x4xf32>,
    %c0_34 = arith.constant 0 : index
    %c12 = arith.constant 12 : index
    %53 = vector.load %arg6[%c0_34, %c12] : memref<8x96xf32, #tpu.memory_space<vmem>>, vector<8x4xf32>
    %c0_35 = arith.constant 0 : index
    %c44 = arith.constant 44 : index
    %54 = vector.load %arg6[%c0_35, %c44] : memref<8x96xf32, #tpu.memory_space<vmem>>, vector<8x4xf32>
    %c0_36 = arith.constant 0 : index
    %c76 = arith.constant 76 : index
    %55 = vector.load %arg6[%c0_36, %c76] : memref<8x96xf32, #tpu.memory_space<vmem>>, vector<8x4xf32>
    %cst_37 = arith.constant dense<0.000000e+00> : vector<8x8xf32>
    %56 = tpu.matmul %53, %54, %cst_37 {dimension_numbers = #tpu.dot_dimension_numbers<[1], [1], [0], [0], [0, 0, 1, 0], [], []>} : vector<8x4xf32>, vector<8x4xf32>, vector<8x8xf32> -> vector<8x8xf32>
    %cst_38 = arith.constant dense<0xFF800000> : vector<8xf32>
    %57 = vector.multi_reduction <maximumf>, %56, %cst_38 [1] : vector<8x8xf32> to vector<8xf32>
    %58 = vector.shape_cast %57 : vector<8xf32> to vector<8x1xf32>
    %59 = vector.broadcast %58 : vector<8x1xf32> to vector<8x8xf32>
    %60 = arith.subf %56, %59 : vector<8x8xf32>
    %61 = math.exp %60 : vector<8x8xf32>
    %cst_39 = arith.constant dense<0.000000e+00> : vector<8xf32>
    %62 = vector.multi_reduction <add>, %61, %cst_39 [1] : vector<8x8xf32> to vector<8xf32>
    %63 = vector.shape_cast %62 : vector<8xf32> to vector<8x1xf32>
    %64 = tpu.reciprocal %63 {approx = true} : vector<8x1xf32> -> vector<8x1xf32>
    %cst_40 = arith.constant dense<0.000000e+00> : vector<8x4xf32>
    %65 = tpu.matmul %61, %55, %cst_40 {dimension_numbers = #tpu.dot_dimension_numbers<[1], [0], [0], [1], [0, 0, 1, 1], [], []>} : vector<8x8xf32>, vector<8x4xf32>, vector<8x4xf32> -> vector<8x4xf32>
    %66 = vector.broadcast %64 : vector<8x1xf32> to vector<8x4xf32>
    %67 = arith.mulf %65, %66 : vector<8x4xf32>
    %c0_41 = arith.constant 0 : index
    %c12_42 = arith.constant 12 : index
    %68 = vector.load %arg7[%c0_41, %c12_42] : memref<8x32xf32, #tpu.memory_space<vmem>>, vector<8x4xf32>
    tpu.vector_store %arg7[%c0_41, %c12_42], %67 {strides = array<i32>} : memref<8x32xf32, #tpu.memory_space<vmem>>, vector<8x4xf32>,
    %c0_43 = arith.constant 0 : index
    %c16 = arith.constant 16 : index
    %69 = vector.load %arg6[%c0_43, %c16] : memref<8x96xf32, #tpu.memory_space<vmem>>, vector<8x4xf32>
    %c0_44 = arith.constant 0 : index
    %c48 = arith.constant 48 : index
    %70 = vector.load %arg6[%c0_44, %c48] : memref<8x96xf32, #tpu.memory_space<vmem>>, vector<8x4xf32>
    %c0_45 = arith.constant 0 : index
    %c80 = arith.constant 80 : index
    %71 = vector.load %arg6[%c0_45, %c80] : memref<8x96xf32, #tpu.memory_space<vmem>>, vector<8x4xf32>
    %cst_46 = arith.constant dense<0.000000e+00> : vector<8x8xf32>
    %72 = tpu.matmul %69, %70, %cst_46 {dimension_numbers = #tpu.dot_dimension_numbers<[1], [1], [0], [0], [0, 0, 1, 0], [], []>} : vector<8x4xf32>, vector<8x4xf32>, vector<8x8xf32> -> vector<8x8xf32>
    %cst_47 = arith.constant dense<0xFF800000> : vector<8xf32>
    %73 = vector.multi_reduction <maximumf>, %72, %cst_47 [1] : vector<8x8xf32> to vector<8xf32>
    %74 = vector.shape_cast %73 : vector<8xf32> to vector<8x1xf32>
    %75 = vector.broadcast %74 : vector<8x1xf32> to vector<8x8xf32>
    %76 = arith.subf %72, %75 : vector<8x8xf32>
    %77 = math.exp %76 : vector<8x8xf32>
    %cst_48 = arith.constant dense<0.000000e+00> : vector<8xf32>
    %78 = vector.multi_reduction <add>, %77, %cst_48 [1] : vector<8x8xf32> to vector<8xf32>
    %79 = vector.shape_cast %78 : vector<8xf32> to vector<8x1xf32>
    %80 = tpu.reciprocal %79 {approx = true} : vector<8x1xf32> -> vector<8x1xf32>
    %cst_49 = arith.constant dense<0.000000e+00> : vector<8x4xf32>
    %81 = tpu.matmul %77, %71, %cst_49 {dimension_numbers = #tpu.dot_dimension_numbers<[1], [0], [0], [1], [0, 0, 1, 1], [], []>} : vector<8x8xf32>, vector<8x4xf32>, vector<8x4xf32> -> vector<8x4xf32>
    %82 = vector.broadcast %80 : vector<8x1xf32> to vector<8x4xf32>
    %83 = arith.mulf %81, %82 : vector<8x4xf32>
    %c0_50 = arith.constant 0 : index
    %c16_51 = arith.constant 16 : index
    %84 = vector.load %arg7[%c0_50, %c16_51] : memref<8x32xf32, #tpu.memory_space<vmem>>, vector<8x4xf32>
    tpu.vector_store %arg7[%c0_50, %c16_51], %83 {strides = array<i32>} : memref<8x32xf32, #tpu.memory_space<vmem>>, vector<8x4xf32>,
    %c0_52 = arith.constant 0 : index
    %c20 = arith.constant 20 : index
    %85 = vector.load %arg6[%c0_52, %c20] : memref<8x96xf32, #tpu.memory_space<vmem>>, vector<8x4xf32>
    %c0_53 = arith.constant 0 : index
    %c52 = arith.constant 52 : index
    %86 = vector.load %arg6[%c0_53, %c52] : memref<8x96xf32, #tpu.memory_space<vmem>>, vector<8x4xf32>
    %c0_54 = arith.constant 0 : index
    %c84 = arith.constant 84 : index
    %87 = vector.load %arg6[%c0_54, %c84] : memref<8x96xf32, #tpu.memory_space<vmem>>, vector<8x4xf32>
    %cst_55 = arith.constant dense<0.000000e+00> : vector<8x8xf32>
    %88 = tpu.matmul %85, %86, %cst_55 {dimension_numbers = #tpu.dot_dimension_numbers<[1], [1], [0], [0], [0, 0, 1, 0], [], []>} : vector<8x4xf32>, vector<8x4xf32>, vector<8x8xf32> -> vector<8x8xf32>
    %cst_56 = arith.constant dense<0xFF800000> : vector<8xf32>
    %89 = vector.multi_reduction <maximumf>, %88, %cst_56 [1] : vector<8x8xf32> to vector<8xf32>
    %90 = vector.shape_cast %89 : vector<8xf32> to vector<8x1xf32>
    %91 = vector.broadcast %90 : vector<8x1xf32> to vector<8x8xf32>
    %92 = arith.subf %88, %91 : vector<8x8xf32>
    %93 = math.exp %92 : vector<8x8xf32>
    %cst_57 = arith.constant dense<0.000000e+00> : vector<8xf32>
    %94 = vector.multi_reduction <add>, %93, %cst_57 [1] : vector<8x8xf32> to vector<8xf32>
    %95 = vector.shape_cast %94 : vector<8xf32> to vector<8x1xf32>
    %96 = tpu.reciprocal %95 {approx = true} : vector<8x1xf32> -> vector<8x1xf32>
    %cst_58 = arith.constant dense<0.000000e+00> : vector<8x4xf32>
    %97 = tpu.matmul %93, %87, %cst_58 {dimension_numbers = #tpu.dot_dimension_numbers<[1], [0], [0], [1], [0, 0, 1, 1], [], []>} : vector<8x8xf32>, vector<8x4xf32>, vector<8x4xf32> -> vector<8x4xf32>
    %98 = vector.broadcast %96 : vector<8x1xf32> to vector<8x4xf32>
    %99 = arith.mulf %97, %98 : vector<8x4xf32>
    %c0_59 = arith.constant 0 : index
    %c20_60 = arith.constant 20 : index
    %100 = vector.load %arg7[%c0_59, %c20_60] : memref<8x32xf32, #tpu.memory_space<vmem>>, vector<8x4xf32>
    tpu.vector_store %arg7[%c0_59, %c20_60], %99 {strides = array<i32>} : memref<8x32xf32, #tpu.memory_space<vmem>>, vector<8x4xf32>,
    %c0_61 = arith.constant 0 : index
    %c24 = arith.constant 24 : index
    %101 = vector.load %arg6[%c0_61, %c24] : memref<8x96xf32, #tpu.memory_space<vmem>>, vector<8x4xf32>
    %c0_62 = arith.constant 0 : index
    %c56 = arith.constant 56 : index
    %102 = vector.load %arg6[%c0_62, %c56] : memref<8x96xf32, #tpu.memory_space<vmem>>, vector<8x4xf32>
    %c0_63 = arith.constant 0 : index
    %c88 = arith.constant 88 : index
    %103 = vector.load %arg6[%c0_63, %c88] : memref<8x96xf32, #tpu.memory_space<vmem>>, vector<8x4xf32>
    %cst_64 = arith.constant dense<0.000000e+00> : vector<8x8xf32>
    %104 = tpu.matmul %101, %102, %cst_64 {dimension_numbers = #tpu.dot_dimension_numbers<[1], [1], [0], [0], [0, 0, 1, 0], [], []>} : vector<8x4xf32>, vector<8x4xf32>, vector<8x8xf32> -> vector<8x8xf32>
    %cst_65 = arith.constant dense<0xFF800000> : vector<8xf32>
    %105 = vector.multi_reduction <maximumf>, %104, %cst_65 [1] : vector<8x8xf32> to vector<8xf32>
    %106 = vector.shape_cast %105 : vector<8xf32> to vector<8x1xf32>
    %107 = vector.broadcast %106 : vector<8x1xf32> to vector<8x8xf32>
    %108 = arith.subf %104, %107 : vector<8x8xf32>
    %109 = math.exp %108 : vector<8x8xf32>
    %cst_66 = arith.constant dense<0.000000e+00> : vector<8xf32>
    %110 = vector.multi_reduction <add>, %109, %cst_66 [1] : vector<8x8xf32> to vector<8xf32>
    %111 = vector.shape_cast %110 : vector<8xf32> to vector<8x1xf32>
    %112 = tpu.reciprocal %111 {approx = true} : vector<8x1xf32> -> vector<8x1xf32>
    %cst_67 = arith.constant dense<0.000000e+00> : vector<8x4xf32>
    %113 = tpu.matmul %109, %103, %cst_67 {dimension_numbers = #tpu.dot_dimension_numbers<[1], [0], [0], [1], [0, 0, 1, 1], [], []>} : vector<8x8xf32>, vector<8x4xf32>, vector<8x4xf32> -> vector<8x4xf32>
    %114 = vector.broadcast %112 : vector<8x1xf32> to vector<8x4xf32>
    %115 = arith.mulf %113, %114 : vector<8x4xf32>
    %c0_68 = arith.constant 0 : index
    %c24_69 = arith.constant 24 : index
    %116 = vector.load %arg7[%c0_68, %c24_69] : memref<8x32xf32, #tpu.memory_space<vmem>>, vector<8x4xf32>
    tpu.vector_store %arg7[%c0_68, %c24_69], %115 {strides = array<i32>} : memref<8x32xf32, #tpu.memory_space<vmem>>, vector<8x4xf32>,
    %c0_70 = arith.constant 0 : index
    %c28 = arith.constant 28 : index
    %117 = vector.load %arg6[%c0_70, %c28] : memref<8x96xf32, #tpu.memory_space<vmem>>, vector<8x4xf32>
    %c0_71 = arith.constant 0 : index
    %c60 = arith.constant 60 : index
    %118 = vector.load %arg6[%c0_71, %c60] : memref<8x96xf32, #tpu.memory_space<vmem>>, vector<8x4xf32>
    %c0_72 = arith.constant 0 : index
    %c92 = arith.constant 92 : index
    %119 = vector.load %arg6[%c0_72, %c92] : memref<8x96xf32, #tpu.memory_space<vmem>>, vector<8x4xf32>
    %cst_73 = arith.constant dense<0.000000e+00> : vector<8x8xf32>
    %120 = tpu.matmul %117, %118, %cst_73 {dimension_numbers = #tpu.dot_dimension_numbers<[1], [1], [0], [0], [0, 0, 1, 0], [], []>} : vector<8x4xf32>, vector<8x4xf32>, vector<8x8xf32> -> vector<8x8xf32>
    %cst_74 = arith.constant dense<0xFF800000> : vector<8xf32>
    %121 = vector.multi_reduction <maximumf>, %120, %cst_74 [1] : vector<8x8xf32> to vector<8xf32>
    %122 = vector.shape_cast %121 : vector<8xf32> to vector<8x1xf32>
    %123 = vector.broadcast %122 : vector<8x1xf32> to vector<8x8xf32>
    %124 = arith.subf %120, %123 : vector<8x8xf32>
    %125 = math.exp %124 : vector<8x8xf32>
    %cst_75 = arith.constant dense<0.000000e+00> : vector<8xf32>
    %126 = vector.multi_reduction <add>, %125, %cst_75 [1] : vector<8x8xf32> to vector<8xf32>
    %127 = vector.shape_cast %126 : vector<8xf32> to vector<8x1xf32>
    %128 = tpu.reciprocal %127 {approx = true} : vector<8x1xf32> -> vector<8x1xf32>
    %cst_76 = arith.constant dense<0.000000e+00> : vector<8x4xf32>
    %129 = tpu.matmul %125, %119, %cst_76 {dimension_numbers = #tpu.dot_dimension_numbers<[1], [0], [0], [1], [0, 0, 1, 1], [], []>} : vector<8x8xf32>, vector<8x4xf32>, vector<8x4xf32> -> vector<8x4xf32>
    %130 = vector.broadcast %128 : vector<8x1xf32> to vector<8x4xf32>
    %131 = arith.mulf %129, %130 : vector<8x4xf32>
    %c0_77 = arith.constant 0 : index
    %c28_78 = arith.constant 28 : index
    %132 = vector.load %arg7[%c0_77, %c28_78] : memref<8x32xf32, #tpu.memory_space<vmem>>, vector<8x4xf32>
    tpu.vector_store %arg7[%c0_77, %c28_78], %131 {strides = array<i32>} : memref<8x32xf32, #tpu.memory_space<vmem>>, vector<8x4xf32>,
    %c0_79 = arith.constant 0 : index
    %c0_80 = arith.constant 0 : index
    %133 = vector.load %arg7[%c0_79, %c0_80] : memref<8x32xf32, #tpu.memory_space<vmem>>, vector<8x32xf32>
    %c0_81 = arith.constant 0 : index
    %c0_82 = arith.constant 0 : index
    %134 = vector.load %arg3[%c0_81, %c0_82] : memref<32x32xf32, #tpu.memory_space<vmem>>, vector<32x32xf32>
    %cst_83 = arith.constant dense<0.000000e+00> : vector<8x32xf32>
    %135 = tpu.matmul %133, %134, %cst_83 {dimension_numbers = #tpu.dot_dimension_numbers<[1], [0], [0], [1], [0, 0, 1, 1], [], []>} : vector<8x32xf32>, vector<32x32xf32>, vector<8x32xf32> -> vector<8x32xf32>
    %c0_84 = arith.constant 0 : index
    %c0_85 = arith.constant 0 : index
    %136 = vector.load %arg4[%c0_84, %c0_85] : memref<1x32xf32, #tpu.memory_space<vmem>>, vector<1x32xf32>
    %137 = vector.broadcast %136 : vector<1x32xf32> to vector<8x32xf32>
    %138 = arith.addf %135, %137 : vector<8x32xf32>
    %c0_86 = arith.constant 0 : index
    %c0_87 = arith.constant 0 : index
    %c0_88 = arith.constant 0 : index
    %139 = vector.load %arg5[%c0_86, %c0_87, %c0_88] : memref<1x8x32xf32, #tpu.memory_space<vmem>>, vector<1x8x32xf32>
    %140 = vector.shape_cast %139 : vector<1x8x32xf32> to vector<8x32xf32>
    %141 = vector.shape_cast %138 : vector<8x32xf32> to vector<1x8x32xf32>
    tpu.vector_store %arg5[%c0_86, %c0_87, %c0_88], %141 {strides = array<i32>} : memref<1x8x32xf32, #tpu.memory_space<vmem>>, vector<1x8x32xf32>,
    return
  }
  func.func @transform_0(%arg0: i32) -> (i32, i32, i32) {
    %c0_i32 = arith.constant 0 : i32
    %c0_i32_0 = arith.constant 0 : i32
    %c0_i32_1 = arith.constant 0 : i32
    return %arg0, %c0_i32, %c0_i32_0 : i32, i32, i32
  }
  func.func @transform_1(%arg0: i32) -> (i32, i32) {
    %c0_i32 = arith.constant 0 : i32
    %c0_i32_0 = arith.constant 0 : i32
    %c0_i32_1 = arith.constant 0 : i32
    return %c0_i32, %c0_i32_0 : i32, i32
  }
  func.func @transform_2(%arg0: i32) -> (i32, i32) {
    %c0_i32 = arith.constant 0 : i32
    %c0_i32_0 = arith.constant 0 : i32
    %c0_i32_1 = arith.constant 0 : i32
    return %c0_i32, %c0_i32_0 : i32, i32
  }
  func.func @transform_3(%arg0: i32) -> (i32, i32) {
    %c0_i32 = arith.constant 0 : i32
    %c0_i32_0 = arith.constant 0 : i32
    %c0_i32_1 = arith.constant 0 : i32
    return %c0_i32, %c0_i32_0 : i32, i32
  }
  func.func @transform_4(%arg0: i32) -> (i32, i32, i32) {
    %c0_i32 = arith.constant 0 : i32
    %c0_i32_0 = arith.constant 0 : i32
    %c0_i32_1 = arith.constant 0 : i32
    return %arg0, %c0_i32, %c0_i32_0 : i32, i32, i32
  }
}

</mosaic_0001>

<bundles_post_ra>
// kernel: tpu_custom_call.1
= control target key start
LH: loop header
LB: loop body
LE: loop exit
PB: predicated region body
PF: predicated region fallthrough
CT: control target
= control target key end

     0   :  { %9 = vsyncpa [#allocation5], 0  ;;  %s2833_s0 = inlined_call_operand.hbm [shape: f32[2,8,32], index: 0, kind: input, shape index: {}]   ;;  %s2834_s1 = inlined_call_operand.hbm [shape: f32[32,96], index: 1, kind: input, shape index: {}]   ;;  %s2835_s2 = inlined_call_operand.hbm [shape: f32[32,32], index: 2, kind: input, shape index: {}]   ;;  %s2836_s3 = inlined_call_operand.vmem [shape: f32[1,32], index: 3, kind: input, shape index: {}]   ;;  %s2837_s4 = inlined_call_operand.hbm [shape: f32[2,8,32], index: 4, kind: output, shape index: {}]  }
   0x1   :  { %11 = vsyncpa [#allocation5 + $0x1], 0 }
   0x2   :  { %12 = vsyncpa [#allocation8], 0 }
   0x3   :  { %13 = vsyncpa [#allocation6], 0 }
   0x4   :  { %15 = vsyncpa [#allocation6 + $0x1], 0  ;;  %s2446_s15 = smov 0   ;;  %s2448_s16 = smov 0  }
   0x5   :  { %s2450_s17 = smov 0   ;;  %s2452_s18 = smov 0  }
   0x6 LB: > { %s2467_s19 = sadd.s32 4294967295, %s2380_s18   ;;  %s1891_s20 = sadd.s32 4294967294, %s2380_s18   ;;  %s2380_s18 = sphi %s2452_s18, %s2857_s18   ;;  %s2376_s17 = sphi %s2450_s17, %s2856_s17   ;;  %s2372_s16 = sphi %s2448_s16, %s2855_s16   ;;  %s2368_s15 = sphi %s2446_s15, %s2854_s15  }
   0x7   : > { %p41_p0 = scmp.ne.s32.totalorder %s2372_s16, %s2368_s15  ;;  %p2838_p1 = scmp.eq.s32.totalorder %s2467_s19, 0 }
   0x8   : > { %p134_p3 = scmp.eq.s32.totalorder %s1891_s20, 1  ;;  %p1892_p5 = scmp.ge.s32.totalorder %s2380_s18, 1 }
   0x9   : > { %p2476_p4 = por %p2838_p1, %p41_p0  ;;  %p141_p7 = scmp.lt.s32.totalorder %s2380_s18, 3 }
   0xa   : > { %p2481_p6 = por %p134_p3, %p41_p0  ;;  %s2382_s24 = smov [#allocation7]  }
   0xb   : > { %s2841_s21 = scalar_select %p2476_p4, 1, 0 }
   0xc   : > { %s2842_s22 = scalar_select %p2481_p6, 1, 0 }
   0xd   : > { %p2486_p8 = pnand %p1892_p5, %p141_p7  ;;  %s153_s25 = sshll.u32 %s2382_s24, 4  ;;  %s2490_s25 = int_to_ptr.vmem [resolvable:$true] %s153_s25 }
   0xe   : > { %s2383_s27 = smov [#allocation9]   ;;  %s2224_s5 = scalar_lea.hbm %s2834_s1, 512 }
   0xf   : > { %p2102_p9 = pneg %p2486_p8  ;;  %s166_s28 = sshll.u32 %s2383_s27, 4  ;;  %s2501_s28 = int_to_ptr.vmem [resolvable:$true] %s166_s28 }
  0x10   : > { %p2225_p12 = scmp.ne.s32.totalorder %s2834_s1, %s2224_s5  ;;  %p2231_p5 = scmp.lt.u32.totalorder %s2224_s5, %s2834_s1 }
  0x11   : > { %p2497_p11 = pnand %p2102_p9, %p2838_p1 }
  0x13   : > { %p2226_p13 = pneg %p2497_p11 }
  0x15   : > { %p2227_p0 = pnand %p2226_p13, %p2225_p12 }
  0x17   : > { %p2228_p3 = pneg %p2227_p0 }
  0x19   : > { %p2233_p7 = pnand %p2231_p5, %p2228_p3 }
  0x1b   : > { %2236 = shalt.err (!%p2233_p7)
}
  0x1c   : > { %s2237_s10 = scalar_lea.vmem %s2490_s25, 512  ;;  %p2245_p2 = scmp.lt.s32.totalorder %s2490_s25, %s2490_s25 }
  0x1d   : > { %p2238_p9 = scmp.ne.s32.totalorder %s2490_s25, %s2237_s10  ;;  %p2246_p12 = scmp.lt.s32.totalorder %s2237_s10, %s2237_s10 }
  0x1f   : > { %p2240_p10 = pnand %p2238_p9, %p2226_p13  ;;  %p2247_p0 = por %p2246_p12, %p2245_p2 }
  0x21   : > { %p2241_p1 = pneg %p2240_p10 }
  0x23   : > { %p2248_p6 = pnand %p2247_p0, %p2241_p1 }
  0x25   : > { %2251 = shalt.err (!%p2248_p6)
}
  0x26   : > { %s2384_s11 = smov 128   ;;  %s2385_s12 = smov 8  }
  0x27   : > { %2105 = dma.hbm_to_vmem [thread:$0]  (!%p2497_p11), %s2834_s1, 512, %s2490_s25, [#allocation8], %s2384_s11, %s2384_s11, %s2385_s12  }
  0x28   : > { %s2252_s27 = scalar_lea.hbm %s2835_s2, 512 }
  0x29   : > { %p2253_p2 = scmp.ne.s32.totalorder %s2835_s2, %s2252_s27  ;;  %p2259_p10 = scmp.lt.u32.totalorder %s2252_s27, %s2835_s2 }
  0x2b   : > { %p2255_p1 = pnand %p2253_p2, %p2226_p13 }
  0x2d   : > { %p2256_p6 = pneg %p2255_p1 }
  0x2f   : > { %p2261_p3 = pnand %p2259_p10, %p2256_p6 }
  0x31   : > { %2264 = shalt.err (!%p2261_p3)
}
  0x32   : > { %s2265_s25 = scalar_lea.vmem %s2501_s28, 512  ;;  %p2273_p12 = scmp.lt.s32.totalorder %s2501_s28, %s2501_s28 }
  0x33   : > { %p2266_p5 = scmp.ne.s32.totalorder %s2501_s28, %s2265_s25  ;;  %p2274_p0 = scmp.lt.s32.totalorder %s2265_s25, %s2265_s25 }
  0x35   : > { %p2268_p7 = pnand %p2266_p5, %p2226_p13  ;;  %p2275_p2 = por %p2274_p0, %p2273_p12 }
  0x37   : > { %p2269_p9 = pneg %p2268_p7 }
  0x39   : > { %p2276_p1 = pnand %p2275_p2, %p2269_p9 }
  0x3b   : > { %2279 = shalt.err (!%p2276_p1)
}
  0x3c   : > { %2108 = dma.hbm_to_vmem [thread:$0]  (!%p2497_p11), %s2835_s2, 512, %s2501_s28, [#allocation8], %s2384_s11, %s2384_s11, %s2385_s12  }
  0x3d   : > { %s2556_s9 = sadd.s32 1, %s2380_s18   ;;  %s28_s26 = sadd.s32 1, %s2376_s17 }
  0x3e   : > { %s25_s10 = ssub.s32 %s2380_s18, %s2556_s9  ;;  %p35_p13 = scmp.ne.s32.totalorder %s2376_s17, %s2372_s16 }
  0x3f   : > { %p26_p6 = scmp.eq.s32.totalorder %s25_s10, 0  ;;  %p36_p10 = scmp.eq.s32.totalorder %s2380_s18, 0 }
  0x40   : > { %p2845_p3 = scmp.eq.s32.totalorder %s2467_s19, 1  ;;  %p2119_p7 = scmp.lt.s32.totalorder %s2380_s18, 2 }
  0x41   : > { %s2572_s14 = scalar_select %p26_p6, %s2376_s17, %s28_s26  }
  0x42   : > { %p2566_p5 = por %p2845_p3, %p35_p13  ;;  %p37_p9 = por %p36_p10, %p35_p13 }
  0x43   : > { %s183_s20 = sand.u32 1, %s2376_s17   ;;  %s1897_s28 = sshll.u32 %s2380_s18, 7 }
  0x44   : > { %s2846_s13 = scalar_select %p2566_p5, 1, 0 }
  0x45   : > { %s1896_s24 = sshll.u32 %s183_s20, 3  ;;  %s2579_s27 = scalar_lea.hbm %s2833_s0, %s1897_s28 }
  0x46   : > { %s187_s29 = scalar_lea.vmem [#allocation4], %s1896_s24  ;;  %p2583_p11 = pnand %p2119_p7, %p37_p9 }
  0x47   : > { %s194_s30 = sshll.u32 %s187_s29, 4  ;;  %s184_s6 = scalar_lea.sflag [#allocation5], %s183_s20  ;;  %s2581_s30 = int_to_ptr.vmem [resolvable:$true] %s194_s30 }
  0x48   : > { %s2280_s25 = scalar_lea.hbm %s2579_s27, 128  ;;  %p2282_p0 = pneg %p2583_p11 }
  0x49   : > { %p2281_p12 = scmp.ne.s32.totalorder %s2579_s27, %s2280_s25  ;;  %s2285_s26 = scalar_lea.hbm %s2833_s0, 256 }
  0x4a   : > { %p2286_p13 = scmp.lt.u32.totalorder %s2579_s27, %s2833_s0  ;;  %p2287_p6 = scmp.lt.u32.totalorder %s2285_s26, %s2280_s25 }
  0x4b   : > { %p2283_p2 = pnand %p2282_p0, %p2281_p12  ;;  %p2289_p3 = scmp.lt.u32.totalorder %s2280_s25, %s2579_s27 }
  0x4c   : > { %p2288_p10 = por %p2287_p6, %p2286_p13 }
  0x4d   : > { %p2284_p1 = pneg %p2283_p2 }
  0x4e   : > { %p2290_p7 = por %p2289_p3, %p2288_p10 }
  0x50   : > { %p2291_p9 = pnand %p2290_p7, %p2284_p1 }
  0x52   : > { %2294 = shalt.err (!%p2291_p9)
}
  0x53   : > { %s2295_s20 = scalar_lea.vmem %s2581_s30, 128  ;;  %s2386_s28 = smov [#allocation4]  }
  0x54   : > { %p2296_p12 = scmp.ne.s32.totalorder %s2581_s30, %s2295_s20  ;;  %s2300_s11 = sshll.u32 %s2386_s28, 4  ;;  %s2301_s11 = int_to_ptr.vmem [resolvable:$false] %s2300_s11 }
  0x55   : > { %s2302_s12 = scalar_lea.vmem %s2301_s11, 256  ;;  %p2303_p4 = scmp.lt.s32.totalorder %s2581_s30, %s2301_s11 }
  0x56   : > { %p2298_p2 = pnand %p2296_p12, %p2282_p0  ;;  %p2304_p13 = scmp.lt.s32.totalorder %s2302_s12, %s2295_s20 }
  0x58   : > { %p2299_p5 = pneg %p2298_p2  ;;  %p2305_p6 = por %p2304_p13, %p2303_p4 }
  0x5a   : > { %p2306_p10 = pnand %p2305_p6, %p2299_p5 }
  0x5c   : > { %2309 = shalt.err (!%p2306_p10)
}
  0x5d   : > { %2112 = dma.hbm_to_vmem [thread:$0]  (!%p2583_p11), %s2579_s27, 128, %s2581_s30, %s184_s6  }
  0x5e   : > { %203 = sbr.rel (%p2486_p8) target bundleno = 1786 (0x6fa), region = 36  ;;  %s2615_s29 = sand.u32 (!%p2486_p8), 1, %s2372_s16  }
  0x5f   : > { %s1899_s25 = sshll.u32 (!%p2486_p8), %s2615_s29, 3  ;;  %s206_s7 = scalar_lea.sflag (!%p2486_p8), [#allocation5], %s2615_s29 }
  0x60   : > { %s209_s8 = scalar_lea.vmem (!%p2486_p8), [#allocation4], %s1899_s25  ;;  %p2848_p4 = scmp.ne.s32.totalorder (!%p2486_p8), %s2841_s21, 0 }
  0x65   : > { %2355 = dma.done.wait (%p2848_p4), %s206_s7, 128  }
  0x66   : > { %2357 = vsyncadd (%p2848_p4), %s206_s7, 4294967168  ;;  %p2849_p5 = scmp.eq.s32.totalorder %s2467_s19, 0 }
  0x68   : > { %2359 = dma.done.wait (%p2849_p5), [#allocation8], 1024   ;;  %p2850_p8 = pmov %p2849_p5 }
  0x69   : > { %v2387_v0 = vmov 0.0|0.0   ;;  %vm2388_vm0 = vmmov 0   ;;  %v2389_v1 = vmov 0.0   ;;  %v243_v2 = vld [vmem:[#allocation7] sm:$0xff]  ;;  %v244_v3 = vld [vmem:[#allocation7 + $0x8] sm:$0xff]  ;;  %v245_v4 = vld [vmem:[#allocation7 + $0x10] sm:$0xff] }
  0x6a   : > { %2361 = vsyncadd (%p2850_p8), [#allocation8], 4294966272  ;;  %2078 = vmatprep.subr.bf16.mxu0 %v2387_v0  ;;  %1984 = vmatprep.mubr.msk.f32.mxu0 %vm2388_vm0, %v2389_v1  ;;  %v2079_v5 = vpack.c.bf16 %v244_v3, %v243_v2  ;;  %v246_v6 = vld [vmem:[#allocation7 + $0x18] sm:$0xff]  ;;  %vm247_vm1 = vcmask 261120   ;;  %vm321_vm2 = vcmask 785408   ;;  %s2390_s21 = smov 64  }
  0x6b   : > { %1987 = vmatprep.subr.mxu1 %v2389_v1  ;;  %1989 = vmatprep.mubr.msk.f32.mxu1 %vm2388_vm0, %v2389_v1  ;;  %v2082_v7 = vpack.c.bf16 %v246_v6, %v245_v4  ;;  %v242_v8 = vld [vmem:[%s209_s8] sm:$0xff]  ;;  %s2391_s23 = smov 96   ;;  %s2392_s27 = smov 92   ;;  %vm327_vm3 = vcmask 31744   ;;  %vm402_vm4 = vcmask 64512   ;;  %vm662_vm5 = vcmask 64544  }
  0x6c   : > { %2080 = vmatpush3.bf16.msra.mxu0 %v2079_v5  ;;  %s2393_s30 = smov 124   ;;  %s2394_s5 = smov 88   ;;  %vm835_vm6 = vcmask 97344   ;;  %vm1008_vm7 = vcmask 130144   ;;  %vm1181_vm8 = vcmask 162944   ;;  %vm1354_vm9 = vcmask 195744  }
  0x6d   : > { %2081 = vmatprep.subr.bf16.mxu0 %v2387_v0  ;;  %s2395_s6 = smov 120   ;;  %s2396_s26 = smov 84   ;;  %vm1527_vm10 = vcmask 228544   ;;  %vm1700_vm11 = vcmask 261344  }
  0x6e   : > { %s2397_s10 = smov 116   ;;  %s2398_s24 = smov 80  }
  0x6f   : > { %s2399_s20 = smov 112   ;;  %s2400_s28 = smov 108  }
  0x70   : > { %2083 = vmatpush3.bf16.msra.mxu0 %v2082_v7  ;;  %s2401_s11 = smov 72   ;;  %s2402_s12 = smov 104  }
  0x71   : > { %2007 = vmatprep.subr.mxu0 %v2389_v1  ;;  %s2403_s7 = smov 68   ;;  %s2404_s8 = smov 100  }
  0x72   : > { %p2851_p0 = scmp.ne.s32.totalorder %s2846_s13, 0 }
  0x73   : > { %1985 = vmatmul.mubr.msk.f32.vlgmr.msra.gmra.mrb[0].mxu0 %vm247_vm1, %v242_v8 }
  0x74   : > { %2009 = vmatprep.mubr.msk.f32.mxu0 %vm2388_vm0, %v2389_v1 }
 0x146   : > { %v317_v9 = vpop.f32.mrb[0].mxu0 }
 0x147   : > { %322 = vst.msk [vmem:[#allocation2] sm:$0xff] %vm321_vm2, %v317_v9  ;;  %v1986_v10 = vpop.f32.mrb[1].mxu0 }
 0x14e   : > { %v2640_v11 = vld [vmem:[#allocation2] sm:$0xff] }
 0x14f   : > { %413 = vrot.lane.b32.xlu1 %v2640_v11, %s2390_s21  ;;  %325 = vrot.lane.b32.xlu0 %v2640_v11, %s2391_s23  ;;  %s2405_s21 = smov 56   ;;  %s2406_s23 = smov 76  }
 0x153   : > { %495 = vrot.lane.b32.xlu1 %v2640_v11, %s2392_s27  ;;  %s2407_s27 = smov 60  }
 0x157   : > { %493 = vrot.lane.b32.xlu1 %v2640_v11, %s2393_s30  ;;  %s2408_s30 = smov 44  }
 0x15b   : > { %668 = vrot.lane.b32.xlu1 %v2640_v11, %s2394_s5  ;;  %s2409_s5 = smov 52  }
 0x15f   : > { %666 = vrot.lane.b32.xlu1 %v2640_v11, %s2395_s6  ;;  %s2410_s6 = smov 36  }
 0x163   : > { %841 = vrot.lane.b32.xlu1 %v2640_v11, %s2396_s26  ;;  %s2411_s26 = smov 48  }
 0x167   : > { %839 = vrot.lane.b32.xlu1 %v2640_v11, %s2397_s10  ;;  %s2412_s10 = smov 40  }
 0x16b   : > { %1014 = vrot.lane.b32.xlu1 %v2640_v11, %s2398_s24  ;;  %s2413_s24 = smov 4  }
 0x16f   : > { %1012 = vrot.lane.b32.xlu1 %v2640_v11, %s2399_s20  ;;  %s2414_s20 = smov 8  }
 0x173   : > { %1185 = vrot.lane.b32.xlu1 %v2640_v11, %s2400_s28  ;;  %s2415_s28 = smov 12  }
 0x177   : > { %1360 = vrot.lane.b32.xlu1 %v2640_v11, %s2401_s11  ;;  %s2416_s11 = smov 16  }
 0x17b   : > { %1358 = vrot.lane.b32.xlu1 %v2640_v11, %s2402_s12  ;;  %s2417_s12 = smov 20  }
 0x17f   : > { %1533 = vrot.lane.b32.xlu1 %v2640_v11, %s2403_s7  ;;  %s2418_s7 = smov 24  }
 0x183   : > { %1531 = vrot.lane.b32.xlu1 %v2640_v11, %s2404_s8  ;;  %s2419_s8 = smov 28  }
 0x187   : > { %754 = vrot.lane.b32.xlu1 %v2640_v11, %s2405_s21 }
 0x1c1   : > { %v414_v12 = vpop.permute.xlu1 %413  ;;  %v326_v13 = vpop.permute.xlu0 %325 }
 0x1c2   : > { %1988 = vmatpush3.xpose.msk.msra.mxu1 %vm327_vm3, %v326_v13 }
 0x1c3   : > { %1992 = vmatprep.subr.mxu1 %v2389_v1 }
 0x1c5   : > { %v2660_v14 = vpop.permute.xlu1 %495  ;;  %1990 = vmatmul.mubr.msk.f32.vlgmr.msra.gmra.mrb[0].mxu1 %vm327_vm3, %v2640_v11 }
 0x1c6   : > { %1993 = vmatpush3.msra.mxu1 %v414_v12  ;;  %1994 = vmatprep.mubr.msk.f32.mxu1 %vm2388_vm0, %v2389_v1 }
 0x1c7   : > { %1997 = vmatprep.subr.mxu1 %v2389_v1 }
 0x1c9   : > { %v2667_v15 = vpop.permute.xlu1 %493 }
 0x1cd   : > { %v669_v16 = vpop.permute.xlu1 %668 }
 0x1ce   : > { %2008 = vmatpush3.xpose.msk.msra.mxu0 %vm327_vm3, %v669_v16 }
 0x1cf   : > { %2017 = vmatprep.subr.mxu0 %v2389_v1 }
 0x1d1   : > { %v667_v17 = vpop.permute.xlu1 %666 }
 0x1d2   : > { %2010 = vmatmul.mubr.msk.f32.vlgmr.msra.gmra.mrb[2].mxu0 %vm327_vm3, %v667_v17 }
 0x1d3   : > { %2019 = vmatprep.mubr.msk.f32.mxu0 %vm2388_vm0, %v2389_v1 }
 0x1d5   : > { %v842_v18 = vpop.permute.xlu1 %841 }
 0x1d6   : > { %2018 = vmatpush3.xpose.msk.msra.mxu0 %vm327_vm3, %v842_v18 }
 0x1d7   : > { %2027 = vmatprep.subr.mxu0 %v2389_v1 }
 0x1d9   : > { %v840_v19 = vpop.permute.xlu1 %839 }
 0x1da   : > { %2020 = vmatmul.mubr.msk.f32.vlgmr.msra.gmra.mrb[4].mxu0 %vm327_vm3, %v840_v19 }
 0x1db   : > { %2029 = vmatprep.mubr.msk.f32.mxu0 %vm2388_vm0, %v2389_v1 }
 0x1dd   : > { %v1015_v20 = vpop.permute.xlu1 %1014 }
 0x1de   : > { %2028 = vmatpush3.xpose.msk.msra.mxu0 %vm327_vm3, %v1015_v20 }
 0x1df   : > { %2037 = vmatprep.subr.mxu0 %v2389_v1 }
 0x1e1   : > { %v1013_v21 = vpop.permute.xlu1 %1012 }
 0x1e2   : > { %2030 = vmatmul.mubr.msk.f32.vlgmr.msra.gmra.mrb[6].mxu0 %vm327_vm3, %v1013_v21 }
 0x1e3   : > { %2039 = vmatprep.mubr.msk.f32.mxu0 %vm2388_vm0, %v2389_v1 }
 0x1e5   : > { %v1186_v34 = vpop.permute.xlu1 %1185 }
 0x1e9   : > { %v1361_v35 = vpop.permute.xlu1 %1360 }
 0x1ed   : > { %v1359_v38 = vpop.permute.xlu1 %1358 }
 0x1f1   : > { %v1534_v41 = vpop.permute.xlu1 %1533 }
 0x1f5   : > { %v1532_v43 = vpop.permute.xlu1 %1531 }
 0x1f9   : > { %v755_v12 = vpop.permute.xlu1 %754 }
 0x298   : > { %v398_v22 = vpop.f32.mrb[0].mxu1 }
 0x299   : > { %v1991_v23 = vpop.f32.mrb[1].mxu1  ;;  %v403_v24 = vsel %vm402_vm4, %v398_v22, -inf }
 0x29a   : > { %404 = vmax.xlane.f32.xlu0 %v403_v24 }
 0x2a5   : > { %v2685_v25 = vpop.f32.mrb[2].mxu0 }
 0x2a6   : > { %v2011_v26 = vpop.f32.mrb[3].mxu0  ;;  %v744_v31 = vsel %vm402_vm4, %v2685_v25, -inf }
 0x2ad   : > { %v2687_v27 = vpop.f32.mrb[4].mxu0 }
 0x2ae   : > { %v2021_v28 = vpop.f32.mrb[5].mxu0  ;;  %v917_v32 = vsel %vm402_vm4, %v2687_v27, -inf }
 0x2b0   : > { %1187 = vrot.lane.b32.xlu0 %v2640_v11, %s2406_s23 }
 0x2b4   : > { %581 = vrot.lane.b32.xlu0 %v2640_v11, %s2407_s27  ;;  %s1931_s27 = sshll.u32 %s2467_s19, 7 }
 0x2b5   : > { %v2691_v29 = vpop.f32.mrb[6].mxu0 }
 0x2b6   : > { %v2031_v30 = vpop.f32.mrb[7].mxu0  ;;  %v1090_v33 = vsel %vm402_vm4, %v2691_v29, -inf }
 0x2d3   : > { %745 = vmax.xlane.f32.xlu0 %v744_v31 }
 0x2d7   : > { %918 = vmax.xlane.f32.xlu0 %v917_v32 }
 0x2db   : > { %1091 = vmax.xlane.f32.xlu0 %v1090_v33 }
 0x327   : > { %v405_v36 = vpop.xlane.xlu0 %404 }
 0x328   : > { %v406_v37 = vsub.f32 %v398_v22, %v405_v36 }
 0x32a   : > { %v407_v39 = vmul.f32 1.442695, %v406_v37 }
 0x32b   : > { %v1188_v40 = vpop.permute.xlu0 %1187 }
 0x32c   : > { %2192 = vpow2.f32 %v407_v39  ;;  %2038 = vmatpush3.xpose.msk.msra.mxu0 %vm327_vm3, %v1188_v40 }
 0x32d   : > { %2047 = vmatprep.subr.mxu0 %v2389_v1 }
 0x32f   : > { %2040 = vmatmul.mubr.msk.f32.vlgmr.msra.gmra.mrb[8].mxu0 %vm327_vm3, %v1186_v34  ;;  %v582_v44 = vpop.permute.xlu0 %581 }
 0x330   : > { %2048 = vmatpush3.xpose.msk.msra.mxu0 %vm327_vm3, %v1361_v35  ;;  %2049 = vmatprep.mubr.msk.f32.mxu0 %vm2388_vm0, %v2389_v1 }
 0x331   : > { %2057 = vmatprep.subr.mxu0 %v2389_v1 }
 0x333   : > { %2050 = vmatmul.mubr.msk.f32.vlgmr.msra.gmra.mrb[10].mxu0 %vm327_vm3, %v1359_v38 }
 0x334   : > { %2058 = vmatpush3.xpose.msk.msra.mxu0 %vm327_vm3, %v1534_v41  ;;  %2059 = vmatprep.mubr.msk.f32.mxu0 %vm2388_vm0, %v2389_v1 }
 0x335   : > { %2084 = vmatprep.subr.bf16.mxu0 %v2387_v0 }
 0x336   : > { %v2711_v42 = vpop.eup %2192 }
 0x337   : > { %1995 = vmatmul.mubr.msk.f32.vlgmr.msra.gmra.mrb[2].mxu1 %vm402_vm4, %v2711_v42  ;;  %2060 = vmatmul.mubr.msk.f32.vlgmr.msra.gmra.mrb[12].mxu0 %vm327_vm3, %v1532_v43 }
 0x338   : > { %1998 = vmatpush3.xpose.msk.msra.mxu1 %vm327_vm3, %v2660_v14  ;;  %1999 = vmatprep.mubr.msk.f32.mxu1 %vm2388_vm0, %v2389_v1 }
 0x339   : > { %2002 = vmatprep.subr.mxu1 %v2389_v1  ;;  %2075 = vmatprep.mubr.msk.f32.mxu0 %vm2388_vm0, %v2389_v1 }
 0x33b   : > { %2000 = vmatmul.mubr.msk.f32.vlgmr.msra.gmra.mrb[4].mxu1 %vm327_vm3, %v2667_v15 }
 0x33c   : > { %2003 = vmatpush3.msra.mxu1 %v582_v44  ;;  %2004 = vmatprep.mubr.msk.f32.mxu1 %vm2388_vm0, %v2389_v1 }
 0x33d   : > { %2012 = vmatprep.subr.mxu1 %v2389_v1 }
 0x360   : > { %v746_v59 = vpop.xlane.xlu0 %745 }
 0x361   : > { %v747_v61 = vsub.f32 %v2685_v25, %v746_v59 }
 0x363   : > { %v748_v62 = vmul.f32 1.442695, %v747_v61 }
 0x364   : > { %v919_v60 = vpop.xlane.xlu0 %918 }
 0x365   : > { %v920_v63 = vsub.f32 %v2687_v27, %v919_v60  ;;  %2194 = vpow2.f32 %v748_v62  ;;  %v409_v27 = vsel %vm402_vm4, %v2711_v42, 0.0 }
 0x367   : > { %v921_v3 = vmul.f32 1.442695, %v920_v63 }
 0x368   : > { %v1092_v2 = vpop.xlane.xlu0 %1091 }
 0x369   : > { %v1093_v4 = vsub.f32 %v2691_v29, %v1092_v2  ;;  %2196 = vpow2.f32 %v921_v3  ;;  %v1703_v2 = vld [vmem:[#allocation9] sm:$0xff]  ;;  %v1704_v3 = vld [vmem:[#allocation9 + $0x8] sm:$0xff] }
 0x36b   : > { %v1094_v5 = vmul.f32 1.442695, %v1093_v4  ;;  %v2085_v4 = vpack.c.bf16 %v1704_v3, %v1703_v2 }
 0x36d   : > { %2198 = vpow2.f32 %v1094_v5  ;;  %v1705_v5 = vld [vmem:[#allocation9 + $0x10] sm:$0xff]  ;;  %2086 = vmatpush3.bf16.msra.mxu0 %v2085_v4 }
 0x36e   : > { %2087 = vmatprep.subr.bf16.mxu0 %v2387_v0 }
 0x36f   : > { %v2195_v6 = vpop.eup %2194 }
 0x370   : > { %v750_v7 = vsel %vm402_vm4, %v2195_v6, 0.0 }
 0x373   : > { %v2197_v8 = vpop.eup %2196 }
 0x374   : > { %v923_v9 = vsel %vm402_vm4, %v2197_v8, 0.0 }
 0x377   : > { %v2199_v10 = vpop.eup %2198 }
 0x402   : > { %v1259_v45 = vpop.f32.mrb[8].mxu0 }
 0x403   : > { %v2041_v46 = vpop.f32.mrb[9].mxu0  ;;  %v1263_v47 = vsel %vm402_vm4, %v1259_v45, -inf }
 0x404   : > { %1264 = vmax.xlane.f32.xlu1 %v1263_v47 }
 0x406   : > { %v1432_v48 = vpop.f32.mrb[10].mxu0 }
 0x407   : > { %v2051_v49 = vpop.f32.mrb[11].mxu0  ;;  %v1436_v50 = vsel %vm402_vm4, %v1432_v48, -inf }
 0x408   : > { %1437 = vmax.xlane.f32.xlu0 %v1436_v50 }
 0x40a   : > { %v2730_v51 = vpop.f32.mrb[2].mxu1  ;;  %v1605_v52 = vpop.f32.mrb[12].mxu0 }
 0x40b   : > { %v1996_v53 = vpop.f32.mrb[3].mxu1  ;;  %v2061_v54 = vpop.f32.mrb[13].mxu0  ;;  %v1609_v55 = vsel %vm402_vm4, %v1605_v52, -inf }
 0x40c   : > { %1610 = vmax.xlane.f32.xlu1 %v1609_v55 }
 0x40e   : > { %v567_v56 = vpop.f32.mrb[4].mxu1 }
 0x40f   : > { %v2001_v57 = vpop.f32.mrb[5].mxu1  ;;  %v571_v58 = vsel %vm402_vm4, %v567_v56, -inf }
 0x410   : > { %572 = vmax.xlane.f32.xlu1 %v571_v58 }
 0x41e   : > { %1273 = vrot.lane.b32.xlu0 %v2640_v11, %s2408_s30  ;;  %s241_s30 = scalar_lea.vmem [#allocation10], %s1899_s25  ;;  %s2420_s25 = smov [#allocation10]  }
 0x421   : > { %927 = vrot.lane.b32.xlu1 %v2640_v11, %s2409_s5  ;;  %s1802_s5 = sshll.u32 %s241_s30, 4  ;;  %s2790_s5 = int_to_ptr.vmem [resolvable:$true] %s1802_s5 }
 0x422   : > { %1619 = vrot.lane.b32.xlu0 %v2640_v11, %s2410_s6  ;;  %s2310_s19 = scalar_lea.vmem %s2790_s5, 128 }
 0x423   : > { %p2311_p11 = scmp.ne.s32.totalorder %s2790_s5, %s2310_s19 }
 0x425   : > { %1100 = vrot.lane.b32.xlu1 %v2640_v11, %s2411_s26  ;;  %p2312_p1 = pnand %p2311_p11, %p2851_p0 }
 0x427   : > { %p2313_p3 = pneg %p2312_p1 }
 0x429   : > { %1446 = vrot.lane.b32.xlu1 %v2640_v11, %s2412_s10  ;;  %v1096_v11 = vsel %vm402_vm4, %v2199_v10, 0.0  ;;  %s2788_s10 = scalar_lea.hbm %s2837_s4, %s1931_s27 }
 0x441   : > { %751 = vadd.xlane.f32.xlu0 %v750_v7 }
 0x445   : > { %924 = vadd.xlane.f32.xlu0 %v923_v9 }
 0x449   : > { %1097 = vadd.xlane.f32.xlu0 %v1096_v11 }
 0x491   : > { %v1265_v13 = vpop.xlane.xlu1 %1264 }
 0x492   : > { %v1266_v18 = vsub.f32 %v1259_v45, %v1265_v13 }
 0x494   : > { %v1267_v21 = vmul.f32 1.442695, %v1266_v18 }
 0x495   : > { %v1438_v14 = vpop.xlane.xlu0 %1437 }
 0x496   : > { %v1439_v15 = vsub.f32 %v1432_v48, %v1438_v14 }
 0x498   : > { %v1440_v16 = vmul.f32 1.442695, %v1439_v15 }
 0x499   : > { %v1611_v17 = vpop.xlane.xlu1 %1610  ;;  %v1274_v36 = vpop.permute.xlu0 %1273 }
 0x49a   : > { %2200 = vpow2.f32 %v1440_v16  ;;  %v1612_v22 = vsub.f32 %v1605_v52, %v1611_v17 }
 0x49c   : > { %v1613_v25 = vmul.f32 1.442695, %v1612_v22 }
 0x49d   : > { %v573_v19 = vpop.xlane.xlu1 %572  ;;  %v1620_v38 = vpop.permute.xlu0 %1619 }
 0x49e   : > { %v574_v20 = vsub.f32 %v567_v56, %v573_v19 }
 0x4a0   : > { %v575_v23 = vmul.f32 1.442695, %v574_v20 }
 0x4a1   : > { %v928_v31 = vpop.permute.xlu1 %927 }
 0x4a2   : > { %2202 = vpow2.f32 %v575_v23 }
 0x4a3   : > { %2204 = vpow2.f32 %v1267_v21 }
 0x4a4   : > { %v2201_v24 = vpop.eup %2200  ;;  %2206 = vpow2.f32 %v1613_v25 }
 0x4a5   : > { %v1442_v26 = vsel %vm402_vm4, %v2201_v24, 0.0  ;;  %v1101_v34 = vpop.permute.xlu1 %1100 }
 0x4a6   : > { %1443 = vadd.xlane.f32.xlu0 %v1442_v26 }
 0x4a9   : > { %v1447_v37 = vpop.permute.xlu1 %1446 }
 0x4aa   : > { %410 = vadd.xlane.f32.xlu0 %v409_v27  ;;  %v1928_v27 = vld [vmem:[%s2836_s3] ss:$0 sm:$0xff] }
 0x4ac   : > { %v2203_v28 = vpop.eup %2202 }
 0x4ad   : > { %2005 = vmatmul.mubr.msk.f32.vlgmr.msra.gmra.mrb[6].mxu1 %vm402_vm4, %v2203_v28  ;;  %v577_v29 = vsel %vm402_vm4, %v2203_v28, 0.0  ;;  %v2205_v30 = vpop.eup %2204 }
 0x4ae   : > { %2013 = vmatpush3.msra.mxu1 %v755_v12  ;;  %578 = vadd.xlane.f32.xlu1 %v577_v29  ;;  %v1269_v32 = vsel %vm402_vm4, %v2205_v30, 0.0  ;;  %v2207_v33 = vpop.eup %2206 }
 0x4af   : > { %2014 = vmatprep.mubr.msk.f32.mxu1 %vm2388_vm0, %v2389_v1  ;;  %2022 = vmatprep.subr.mxu1 %v2389_v1  ;;  %v1615_v35 = vsel %vm402_vm4, %v2207_v33, 0.0 }
 0x4b1   : > { %2015 = vmatmul.mubr.msk.f32.vlgmr.msra.gmra.mrb[8].mxu1 %vm402_vm4, %v2195_v6  ;;  %v1706_v6 = vld [vmem:[#allocation9 + $0x18] sm:$0xff] }
 0x4b2   : > { %2023 = vmatpush3.msra.mxu1 %v928_v31  ;;  %1270 = vadd.xlane.f32.xlu1 %v1269_v32  ;;  %v2088_v9 = vpack.c.bf16 %v1706_v6, %v1705_v5 }
 0x4b3   : > { %2024 = vmatprep.mubr.msk.f32.mxu1 %vm2388_vm0, %v2389_v1  ;;  %2032 = vmatprep.subr.mxu1 %v2389_v1 }
 0x4b4   : > { %2089 = vmatpush3.bf16.msra.mxu0 %v2088_v9 }
 0x4b5   : > { %2025 = vmatmul.mubr.msk.f32.vlgmr.msra.gmra.mrb[10].mxu1 %vm402_vm4, %v2197_v8 }
 0x4b6   : > { %2033 = vmatpush3.msra.mxu1 %v1101_v34  ;;  %1616 = vadd.xlane.f32.xlu1 %v1615_v35 }
 0x4b7   : > { %2034 = vmatprep.mubr.msk.f32.mxu1 %vm2388_vm0, %v2389_v1  ;;  %2042 = vmatprep.subr.mxu1 %v2389_v1 }
 0x4b9   : > { %2035 = vmatmul.mubr.msk.f32.vlgmr.msra.gmra.mrb[12].mxu1 %vm402_vm4, %v2199_v10 }
 0x4ba   : > { %2043 = vmatpush3.msra.mxu1 %v1274_v36  ;;  %2044 = vmatprep.mubr.msk.f32.mxu1 %vm2388_vm0, %v2389_v1 }
 0x4bb   : > { %2052 = vmatprep.subr.mxu1 %v2389_v1 }
 0x4bd   : > { %2045 = vmatmul.mubr.msk.f32.vlgmr.msra.gmra.mrb[14].mxu1 %vm402_vm4, %v2205_v30 }
 0x4be   : > { %2053 = vmatpush3.msra.mxu1 %v1447_v37  ;;  %2054 = vmatprep.mubr.msk.f32.mxu1 %vm2388_vm0, %v2389_v1 }
 0x4bf   : > { %2062 = vmatprep.subr.mxu1 %v2389_v1 }
 0x4c1   : > { %2055 = vmatmul.mubr.msk.f32.vlgmr.msra.gmra.mrb[16].mxu1 %vm402_vm4, %v2201_v24 }
 0x4c2   : > { %2063 = vmatpush3.msra.mxu1 %v1620_v38  ;;  %2064 = vmatprep.mubr.msk.f32.mxu1 %vm2388_vm0, %v2389_v1 }
 0x4c5   : > { %2065 = vmatmul.mubr.msk.f32.vlgmr.msra.gmra.mrb[18].mxu1 %vm402_vm4, %v2207_v33 }
 0x4ce   : > { %v752_v39 = vpop.xlane.xlu0 %751 }
 0x4d2   : > { %v925_v40 = vpop.xlane.xlu0 %924 }
 0x4d6   : > { %v1098_v41 = vpop.xlane.xlu0 %1097 }
 0x533   : > { %v1444_v42 = vpop.xlane.xlu0 %1443 }
 0x537   : > { %v411_v43 = vpop.xlane.xlu0 %410 }
 0x538   : > { %2208 = vrcp.f32 %v411_v43 }
 0x53b   : > { %v579_v46 = vpop.xlane.xlu1 %578 }
 0x53c   : > { %2210 = vrcp.f32 %v579_v46 }
 0x53d   : > { %2212 = vrcp.f32 %v752_v39 }
 0x53e   : > { %2214 = vrcp.f32 %v925_v40 }
 0x53f   : > { %2216 = vrcp.f32 %v1098_v41  ;;  %v1271_v50 = vpop.xlane.xlu1 %1270 }
 0x540   : > { %2218 = vrcp.f32 %v1271_v50 }
 0x541   : > { %2220 = vrcp.f32 %v1444_v42 }
 0x542   : > { %v2209_v44 = vpop.eup %2208 }
 0x543   : > { %v489_v45 = vmul.f32 %v2209_v44, %v2730_v51  ;;  %v1617_v59 = vpop.xlane.xlu1 %1616 }
 0x544   : > { %2222 = vrcp.f32 %v1617_v59 }
 0x545   : > { %490 = vst.msk [vmem:[#allocation3] sm:$0xff] %vm327_vm3, %v489_v45 }
 0x546   : > { %v2211_v47 = vpop.eup %2210 }
 0x547   : > { %v2213_v52 = vpop.eup %2212 }
 0x548   : > { %v2215_v51 = vpop.eup %2214 }
 0x549   : > { %v2217_v60 = vpop.eup %2216 }
 0x54a   : > { %v2219_v7 = vpop.eup %2218 }
 0x54b   : > { %v2221_v12 = vpop.eup %2220 }
 0x54e   : > { %v2223_v16 = vpop.eup %2222 }
 0x580   : > { %v653_v48 = vpop.f32.mrb[6].mxu1 }
 0x581   : > { %v657_v1 = vmul.f32 %v2211_v47, %v653_v48  ;;  %v2006_v49 = vpop.f32.mrb[7].mxu1 }
 0x583   : > { %659 = vrot.lane.b32.xlu1 %v657_v1, %s2413_s24  ;;  %s1789_s24 = scalar_lea.sflag [#allocation6], %s2615_s29 }
 0x584   : > { %v826_v53 = vpop.f32.mrb[8].mxu1 }
 0x585   : > { %v830_v54 = vmul.f32 %v2213_v52, %v826_v53  ;;  %v2016_v55 = vpop.f32.mrb[9].mxu1 }
 0x587   : > { %832 = vrot.lane.b32.xlu0 %v830_v54, %s2414_s20  ;;  %s2314_s20 = sshll.u32 %s2420_s25, 4  ;;  %s2315_s20 = int_to_ptr.vmem [resolvable:$false] %s2314_s20 }
 0x588   : > { %v999_v56 = vpop.f32.mrb[10].mxu1  ;;  %p2317_p7 = scmp.lt.s32.totalorder %s2790_s5, %s2315_s20 }
 0x589   : > { %v1003_v57 = vmul.f32 %v2215_v51, %v999_v56  ;;  %v2026_v58 = vpop.f32.mrb[11].mxu1 }
 0x58b   : > { %1005 = vrot.lane.b32.xlu1 %v1003_v57, %s2415_s28  ;;  %s2316_s28 = scalar_lea.vmem %s2315_s20, 256 }
 0x58c   : > { %v1172_v61 = vpop.f32.mrb[12].mxu1  ;;  %p2318_p9 = scmp.lt.s32.totalorder %s2316_s28, %s2310_s19 }
 0x58d   : > { %v1176_v62 = vmul.f32 %v2217_v60, %v1172_v61  ;;  %v2036_v63 = vpop.f32.mrb[13].mxu1 }
 0x58e   : > { %p2319_p12 = por %p2318_p9, %p2317_p7 }
 0x58f   : > { %1178 = vrot.lane.b32.xlu1 %v1176_v62, %s2416_s11 }
 0x590   : > { %v1345_v8 = vpop.f32.mrb[14].mxu1  ;;  %p2320_p2 = pnand %p2319_p12, %p2313_p3 }
 0x591   : > { %v1349_v10 = vmul.f32 %v2219_v7, %v1345_v8  ;;  %v2046_v11 = vpop.f32.mrb[15].mxu1 }
 0x593   : > { %1351 = vrot.lane.b32.xlu1 %v1349_v10, %s2417_s12 }
 0x594   : > { %v1518_v13 = vpop.f32.mrb[16].mxu1 }
 0x595   : > { %v1522_v14 = vmul.f32 %v2221_v12, %v1518_v13  ;;  %v2056_v15 = vpop.f32.mrb[17].mxu1 }
 0x597   : > { %1524 = vrot.lane.b32.xlu0 %v1522_v14, %s2418_s7 }
 0x598   : > { %v1691_v17 = vpop.f32.mrb[18].mxu1 }
 0x599   : > { %v1695_v18 = vmul.f32 %v2223_v16, %v1691_v17  ;;  %v2066_v19 = vpop.f32.mrb[19].mxu1 }
 0x59b   : > { %1697 = vrot.lane.b32.xlu1 %v1695_v18, %s2419_s8 }
 0x5f5   : > { %v660_v20 = vpop.permute.xlu1 %659 }
 0x5f6   : > { %663 = vst.msk [vmem:[#allocation3] sm:$0xff] %vm662_vm5, %v660_v20 }
 0x5f9   : > { %v833_v0 = vpop.permute.xlu0 %832 }
 0x5fa   : > { %836 = vst.msk [vmem:[#allocation3] sm:$0xff] %vm835_vm6, %v833_v0 }
 0x5fd   : > { %v1006_v21 = vpop.permute.xlu1 %1005 }
 0x5fe   : > { %1009 = vst.msk [vmem:[#allocation3] sm:$0xff] %vm1008_vm7, %v1006_v21 }
 0x601   : > { %v1179_v22 = vpop.permute.xlu1 %1178 }
 0x602   : > { %1182 = vst.msk [vmem:[#allocation3] sm:$0xff] %vm1181_vm8, %v1179_v22 }
 0x605   : > { %v1352_v23 = vpop.permute.xlu1 %1351 }
 0x606   : > { %1355 = vst.msk [vmem:[#allocation3] sm:$0xff] %vm1354_vm9, %v1352_v23 }
 0x609   : > { %v1525_v24 = vpop.permute.xlu0 %1524 }
 0x60a   : > { %1528 = vst.msk [vmem:[#allocation3] sm:$0xff] %vm1527_vm10, %v1525_v24 }
 0x60d   : > { %v1698_v25 = vpop.permute.xlu1 %1697 }
 0x60e   : > { %1701 = vst.msk [vmem:[#allocation3] sm:$0xff] %vm1700_vm11, %v1698_v25 }
 0x615   : > { %v1702_v26 = vld [vmem:[#allocation3] sm:$0xff] }
 0x616   : > { %2076 = vmatmul.mubr.msk.f32.vlgmr.msra.gmra.mrb[14].mxu0 %vm247_vm1, %v1702_v26 }
 0x6e9   : > { %v1783_v28 = vpop.f32.mrb[14].mxu0 }
 0x6ea   : > { %v1784_v29 = vadd.f32 %v1928_v27, %v1783_v28  ;;  %v2077_v30 = vpop.f32.mrb[15].mxu0 }
 0x6ec   : > { %1787 = vst.msk [vmem:[%s241_s30] sm:$0xff] %vm247_vm1, %v1784_v29 }
 0x6ed   : > { %2323 = shalt.err (!%p2320_p2)
}
 0x6ee   : > { %s2324_s29 = scalar_lea.hbm %s2788_s10, 128  ;;  %s2328_s7 = scalar_lea.hbm %s2837_s4, 256 }
 0x6ef   : > { %p2325_p13 = scmp.ne.s32.totalorder %s2788_s10, %s2324_s29  ;;  %p2329_p4 = scmp.lt.u32.totalorder %s2788_s10, %s2837_s4 }
 0x6f0   : > { %p2330_p5 = scmp.lt.u32.totalorder %s2328_s7, %s2324_s29  ;;  %p2332_p11 = scmp.lt.u32.totalorder %s2324_s29, %s2788_s10 }
 0x6f1   : > { %p2326_p6 = pnand %p2325_p13, %p2851_p0 }
 0x6f2   : > { %p2331_p8 = por %p2330_p5, %p2329_p4 }
 0x6f3   : > { %p2327_p10 = pneg %p2326_p6 }
 0x6f4   : > { %p2333_p1 = por %p2332_p11, %p2331_p8 }
 0x6f6   : > { %p2334_p3 = pnand %p2333_p1, %p2327_p10 }
 0x6f8   : > { %2337 = shalt.err (!%p2334_p3)
}
 0x6f9   : > { %2100 = dma.vmem_to_hbm [thread:$0]  (%p2851_p0), %s2790_s5, 128, %s2788_s10, %s1789_s24  }
 0x6fa PF: > { %s1814_s23 = sand.u32 1, %s2368_s15   ;;  %p2852_p7 = scmp.ne.s32.totalorder %s2842_s22, 0 }
 0x6fb   : > { %p2853_p9 = scmp.ge.s32.totalorder %s2380_s18, 2  ;;  %s1815_s27 = scalar_lea.sflag [#allocation6], %s1814_s23 }
 0x6fd   : > { %p2114_p12 = pnand %p2853_p9, %p2852_p7 }
 0x6ff   : > { %2363 = dma.done.wait (!%p2114_p12), %s1815_s27, 128  }
 0x700   : > { %2365 = vsyncadd (!%p2114_p12), %s1815_s27, 4294967168  ;;  %p18_p2 = scmp.ge.s32.totalorder %s2556_s9, 4   ;;  %s2854_s15 = smov %s2372_s16 }
 0x701   : > { %s2855_s16 = smov %s2376_s17  ;;  %s2856_s17 = smov %s2572_s14 }
 0x702   : > { %s2857_s18 = smov %s2556_s9  ;;  %20 = sbr.rel (!%p18_p2) target bundleno = 6 (0x6), region = 89 }
 0x709   :  { %1820 = vsyncpa [#allocation5], 1 }
 0x70a   :  { %1822 = vsyncpa [#allocation5 + $0x1], 1 }
 0x70b   :  { %1823 = vsyncpa [#allocation8], 1 }
 0x70c   :  { %1824 = vsyncpa [#allocation6], 1 }
 0x70d   :  { %1826 = vsyncpa [#allocation6 + $0x1], 1 }

</bundles_post_ra>
